<compile_context>
chip_gen: v7x
topology: tpu7x:2x2x1
jax: 0.10.0
libtpu: 0.0.40
codegen_flags: <defaults>
</compile_context>

<pallas_src>
import functools

import jax
import jax.numpy as jnp
from jax.experimental import pallas as pl
from jax.experimental.pallas import tpu as pltpu

EPS = 1e-5                    # nn.BatchNorm2d default eps
MATMUL_DTYPE = jnp.float32    # set to jnp.bfloat16 in production for MXU peak / half DMA


def _conv_tile_kernel(x_ref, w_ref, b_ref, y_ref, stats_ref):
    """One (image, row-tile) grid step: 3x3 conv + bias + partial BN stats.

    x_ref:     (1, 1, tile_h+2, W+2, Cin)  padded row tile (2-row halo)
    w_ref:     (9, Cin, Cout)              conv weights, tap-major
    b_ref:     (1, Cout)                   conv bias
    y_ref:     (1, tile_h, W, Cout)        conv output tile (f32)
    stats_ref: (1, 1, 2, Cout)             [tile sum(y); tile sum((y-mu_tile)^2)]
    """
    xt = x_ref[0, 0]                              # (tile_h+2, W+2, Cin)
    tile_h = y_ref.shape[1]
    W = y_ref.shape[2]
    cout = y_ref.shape[3]
    rows = tile_h * W

    # 9 tap matmuls on the MXU, accumulated in f32 (no VMEM scratch needed).
    acc = jnp.zeros((rows, cout), jnp.float32)
    for kh in range(3):
        for kw in range(3):
            tap = xt[kh:kh + tile_h, kw:kw + W, :].reshape(rows, -1)
            acc = acc + jnp.dot(tap, w_ref[3 * kh + kw],
                                preferred_element_type=jnp.float32)

    y = acc + b_ref[...]                          # conv bias, (rows, Cout)
    y_ref[...] = y.reshape(y_ref.shape).astype(y_ref.dtype)

    # Welford/Chan-combinable partial statistics for BatchNorm (training mode).
    s = jnp.sum(y, axis=0, keepdims=True)         # (1, Cout)
    mu = s / rows
    ss = jnp.sum((y - mu) ** 2, axis=0, keepdims=True)
    stats_ref[...] = jnp.concatenate([s, ss], axis=0)[None, None]


def _bn_relu_kernel(y_ref, scale_ref, shift_ref, o_ref):
    """Elementwise BN affine + ReLU on one output tile."""
    o_ref[...] = jnp.maximum(y_ref[...] * scale_ref[...] + shift_ref[...], 0.0)


def _pick_tile_h(H, W, Cin, Cout, budget_bytes=4 * 1024 * 1024):
    """Largest divisor of H whose f32 in+out tile fits the per-step budget.

    The pipeline double-buffers each tile, so the total stays well under the
    32 MiB scoped-VMEM limit we request (safe on v7x's 64 MiB physical VMEM).
    """
    best = 1
    for th in range(1, H + 1):
        if H % th:
            continue
        in_bytes = (th + 2) * (W + 2) * Cin * 4
        out_bytes = th * W * Cout * 4
        if in_bytes + out_bytes <= budget_bytes:
            best = th
    return best


def conv3x3_bn_relu(x_nhwc, w_hwio, b, gamma, beta, *, tile_h=None):
    """3x3 conv (stride 1, pad 1) + BatchNorm (batch stats) + ReLU, NHWC."""
    N, H, W, Cin = x_nhwc.shape
    Cout = w_hwio.shape[-1]
    if tile_h is None:
        tile_h = _pick_tile_h(H, W, Cin, Cout)
    if H % tile_h:
        raise ValueError(f"tile_h={tile_h} must divide H={H}")
    n_tiles = H // tile_h
    rows_per_tile = tile_h * W
    total_rows = N * H * W

    # Glue: zero-pad and cut overlapping row-tile windows (2-row halo each,
    # ~(tile_h+2)/tile_h HBM overhead instead of the previous 9x im2col).
    x_pad = jnp.pad(x_nhwc, ((0, 0), (1, 1), (1, 1), (0, 0)))
    x_tiles = jnp.stack(
        [x_pad[:, t * tile_h: t * tile_h + tile_h + 2] for t in range(n_tiles)],
        axis=1).astype(MATMUL_DTYPE)              # (N, n_tiles, tile_h+2, W+2, Cin)
    w_taps = w_hwio.reshape(9, Cin, Cout).astype(MATMUL_DTYPE)

    vmem_params = pltpu.CompilerParams(
        dimension_semantics=("parallel", "parallel"),
        vmem_limit_bytes=32 * 1024 * 1024)

    # Pass 1: conv + bias + per-tile partial BN stats.
    y, stats = pl.pallas_call(
        _conv_tile_kernel,
        out_shape=(
            jax.ShapeDtypeStruct((N, H, W, Cout), jnp.float32),
            jax.ShapeDtypeStruct((N, n_tiles, 2, Cout), jnp.float32),
        ),
        grid_spec=pltpu.PrefetchScalarGridSpec(
            num_scalar_prefetch=0,
            grid=(N, n_tiles),
            in_specs=[
                pl.BlockSpec((1, 1, tile_h + 2, W + 2, Cin),
                             lambda n, t: (n, t, 0, 0, 0)),
                pl.BlockSpec((9, Cin, Cout), lambda n, t: (0, 0, 0)),
                pl.BlockSpec((1, Cout), lambda n, t: (0, 0)),
            ],
            out_specs=(
                pl.BlockSpec((1, tile_h, W, Cout), lambda n, t: (n, t, 0, 0)),
                pl.BlockSpec((1, 1, 2, Cout), lambda n, t: (n, t, 0, 0)),
            ),
        ),
        compiler_params=vmem_params,
        cost_estimate=pl.CostEstimate(
            flops=2 * 9 * N * H * W * Cin * Cout,
            transcendentals=0,
            bytes_accessed=4 * (x_tiles.size + N * H * W * Cout + 9 * Cin * Cout)),
    )(x_tiles, w_taps, b.reshape(1, Cout).astype(jnp.float32))

    # Merge per-tile stats (Chan's parallel-variance formula; exact & stable).
    sums = stats[:, :, 0, :]                      # (N, n_tiles, Cout)
    ssqs = stats[:, :, 1, :]
    mean = jnp.sum(sums, axis=(0, 1)) / total_rows
    tile_mean = sums / rows_per_tile
    m2 = (jnp.sum(ssqs, axis=(0, 1))
          + rows_per_tile * jnp.sum((tile_mean - mean) ** 2, axis=(0, 1)))
    var = m2 / total_rows                         # biased variance, like PyTorch training BN
    scale = gamma * jax.lax.rsqrt(var + EPS)
    shift = beta - mean * scale

    # Pass 2: tiny elementwise affine + ReLU over the same tiles.
    out = pl.pallas_call(
        _bn_relu_kernel,
        out_shape=jax.ShapeDtypeStruct((N, H, W, Cout), jnp.float32),
        grid_spec=pltpu.PrefetchScalarGridSpec(
            num_scalar_prefetch=0,
            grid=(N, n_tiles),
            in_specs=[
                pl.BlockSpec((1, tile_h, W, Cout), lambda n, t: (n, t, 0, 0)),
                pl.BlockSpec((1, Cout), lambda n, t: (0, 0)),
                pl.BlockSpec((1, Cout), lambda n, t: (0, 0)),
            ],
            out_specs=pl.BlockSpec((1, tile_h, W, Cout), lambda n, t: (n, t, 0, 0)),
        ),
        compiler_params=vmem_params,
    )(y, scale.reshape(1, Cout), shift.reshape(1, Cout))
    return out


def conv_block_forward(x_nchw, params, *, tile_h=None):
    """Pallas equivalent of conv_block.forward (NCHW in, NCHW out)."""
    x = jnp.transpose(x_nchw, (0, 2, 3, 1))       # NCHW -> NHWC
    x = conv3x3_bn_relu(x, params["w1_hwio"], params["b1"],
                        params["gamma1"], params["beta1"], tile_h=tile_h)
    x = conv3x3_bn_relu(x, params["w2_hwio"], params["b2"],
                        params["gamma2"], params["beta2"], tile_h=tile_h)
    return jnp.transpose(x, (0, 3, 1, 2))         # NHWC -> NCHW


def init_params(key, in_c, out_c):
    k = jax.random.split(key, 8)
    w1 = 0.2 * jax.random.normal(k[0], (out_c, in_c, 3, 3), jnp.float32)   # OIHW
    b1 = 0.1 * jax.random.normal(k[1], (out_c,), jnp.float32)
    w2 = 0.2 * jax.random.normal(k[2], (out_c, out_c, 3, 3), jnp.float32)  # OIHW
    b2 = 0.1 * jax.random.normal(k[3], (out_c,), jnp.float32)
    gamma1 = 1.0 + 0.1 * jax.random.normal(k[4], (out_c,), jnp.float32)
    beta1 = 0.1 * jax.random.normal(k[5], (out_c,), jnp.float32)
    gamma2 = 1.0 + 0.1 * jax.random.normal(k[6], (out_c,), jnp.float32)
    beta2 = 0.1 * jax.random.normal(k[7], (out_c,), jnp.float32)
    return {
        "w1_oihw": w1, "w1_hwio": jnp.transpose(w1, (2, 3, 1, 0)), "b1": b1,
        "w2_oihw": w2, "w2_hwio": jnp.transpose(w2, (2, 3, 1, 0)), "b2": b2,
        "gamma1": gamma1, "beta1": beta1,
        "gamma2": gamma2, "beta2": beta2,
    }


def ref_forward(x_nchw, params):
    """Pure-JAX reference mirroring the PyTorch module (training-mode BN)."""
    def conv(x, w, b):
        y = jax.lax.conv_general_dilated(
            x, w, window_strides=(1, 1), padding=((1, 1), (1, 1)),
            dimension_numbers=("NCHW", "OIHW", "NCHW"))
        return y + b[None, :, None, None]

    def bn_relu(x, gamma, beta):
        mean = jnp.mean(x, axis=(0, 2, 3), keepdims=True)
        var = jnp.mean((x - mean) ** 2, axis=(0, 2, 3), keepdims=True)  # biased
        y = (x - mean) / jnp.sqrt(var + EPS)
        y = y * gamma[None, :, None, None] + beta[None, :, None, None]
        return jnp.maximum(y, 0.0)

    x = bn_relu(conv(x_nchw, params["w1_oihw"], params["b1"]),
                params["gamma1"], params["beta1"])
    x = bn_relu(conv(x, params["w2_oihw"], params["b2"]),
                params["gamma2"], params["beta2"])
    return x


if __name__ == "__main__":
    key = jax.random.PRNGKey(0)
    kx, kp = jax.random.split(key)

    N, in_c, out_c, H, W = 2, 4, 8, 16, 16
    x = jax.random.normal(kx, (N, in_c, H, W), jnp.float32)  # NCHW, like PyTorch
    params = init_params(kp, in_c, out_c)

    # tile_h=8 -> grid (N=2, n_tiles=2): exercises the row-tiled path and the
    # cross-tile BN-stats merge even at this toy size.
    fwd = functools.partial(conv_block_forward, tile_h=8)
    out = jax.block_until_ready(fwd(x, params))
    assert out.shape == (N, out_c, H, W)

    ref = ref_forward(x, params)
    max_err = float(jnp.max(jnp.abs(out - ref)))
    if max_err > 2e-3:
        raise AssertionError(f"Pallas output mismatch vs reference: {max_err}")

    print("KERNEL_OK")
</pallas_src>

<mosaic_0001>
module attributes {stable_mosaic.version = 11 : i64} {
  func.func @_conv_tile_kernel(%arg0: i32, %arg1: i32, %arg2: memref<1x1x10x18x4xf32, #tpu.memory_space<vmem>>, %arg3: memref<9x4x8xf32, #tpu.memory_space<vmem>>, %arg4: memref<1x8xf32, #tpu.memory_space<vmem>>, %arg5: memref<1x8x16x8xf32, #tpu.memory_space<vmem>>, %arg6: memref<1x1x2x8xf32, #tpu.memory_space<vmem>>) attributes {dimension_semantics = [#tpu.dimension_semantics<parallel>, #tpu.dimension_semantics<parallel>], iteration_bounds = array<i64: 2, 2>, scalar_prefetch = 0 : i64, scratch_operands = 0 : i64, tpu.core_type = #tpu.core_type<tc>, window_params = [{transform_indices = @transform_0, window_bounds = array<i64: 1, 1, 10, 18, 4>}, {pipeline_mode = #tpu.pipeline_mode<synchronous>, transform_indices = @transform_1, window_bounds = array<i64: 9, 4, 8>}, {pipeline_mode = #tpu.pipeline_mode<synchronous>, transform_indices = @transform_2, window_bounds = array<i64: 1, 8>}, {transform_indices = @transform_3, window_bounds = array<i64: 1, 8, 16, 8>}, {transform_indices = @transform_4, window_bounds = array<i64: 1, 1, 2, 8>}]} {
    %c0 = arith.constant 0 : index
    %c0_0 = arith.constant 0 : index
    %c0_1 = arith.constant 0 : index
    %c0_2 = arith.constant 0 : index
    %c0_3 = arith.constant 0 : index
    %0 = vector.load %arg2[%c0, %c0_0, %c0_1, %c0_2, %c0_3] : memref<1x1x10x18x4xf32, #tpu.memory_space<vmem>>, vector<1x1x10x18x4xf32>
    %1 = vector.shape_cast %0 : vector<1x1x10x18x4xf32> to vector<10x18x4xf32>
    %cst = arith.constant 0.000000e+00 : f32
    %2 = vector.broadcast %cst : f32 to vector<128x8xf32>
    %3 = vector.extract_strided_slice %1 {offsets = [0, 0, 0], sizes = [8, 16, 4], strides = [1, 1, 1]} : vector<10x18x4xf32> to vector<8x16x4xf32>
    %4 = vector.shape_cast %3 : vector<8x16x4xf32> to vector<128x4xf32>
    %c0_4 = arith.constant 0 : index
    %c0_5 = arith.constant 0 : index
    %c0_6 = arith.constant 0 : index
    %5 = vector.load %arg3[%c0_4, %c0_5, %c0_6] : memref<9x4x8xf32, #tpu.memory_space<vmem>>, vector<1x4x8xf32>
    %6 = vector.shape_cast %5 : vector<1x4x8xf32> to vector<4x8xf32>
    %cst_7 = arith.constant dense<0.000000e+00> : vector<128x8xf32>
    %7 = tpu.matmul %4, %6, %cst_7 {dimension_numbers = #tpu.dot_dimension_numbers<[1], [0], [0], [1], [0, 0, 1, 1], [], []>} : vector<128x4xf32>, vector<4x8xf32>, vector<128x8xf32> -> vector<128x8xf32>
    %8 = arith.addf %2, %7 : vector<128x8xf32>
    %9 = vector.extract_strided_slice %1 {offsets = [0, 1, 0], sizes = [8, 16, 4], strides = [1, 1, 1]} : vector<10x18x4xf32> to vector<8x16x4xf32>
    %10 = vector.shape_cast %9 : vector<8x16x4xf32> to vector<128x4xf32>
    %c1 = arith.constant 1 : index
    %c0_8 = arith.constant 0 : index
    %c0_9 = arith.constant 0 : index
    %11 = vector.load %arg3[%c1, %c0_8, %c0_9] : memref<9x4x8xf32, #tpu.memory_space<vmem>>, vector<1x4x8xf32>
    %12 = vector.shape_cast %11 : vector<1x4x8xf32> to vector<4x8xf32>
    %cst_10 = arith.constant dense<0.000000e+00> : vector<128x8xf32>
    %13 = tpu.matmul %10, %12, %cst_10 {dimension_numbers = #tpu.dot_dimension_numbers<[1], [0], [0], [1], [0, 0, 1, 1], [], []>} : vector<128x4xf32>, vector<4x8xf32>, vector<128x8xf32> -> vector<128x8xf32>
    %14 = arith.addf %8, %13 : vector<128x8xf32>
    %15 = vector.extract_strided_slice %1 {offsets = [0, 2, 0], sizes = [8, 16, 4], strides = [1, 1, 1]} : vector<10x18x4xf32> to vector<8x16x4xf32>
    %16 = vector.shape_cast %15 : vector<8x16x4xf32> to vector<128x4xf32>
    %c2 = arith.constant 2 : index
    %c0_11 = arith.constant 0 : index
    %c0_12 = arith.constant 0 : index
    %17 = vector.load %arg3[%c2, %c0_11, %c0_12] : memref<9x4x8xf32, #tpu.memory_space<vmem>>, vector<1x4x8xf32>
    %18 = vector.shape_cast %17 : vector<1x4x8xf32> to vector<4x8xf32>
    %cst_13 = arith.constant dense<0.000000e+00> : vector<128x8xf32>
    %19 = tpu.matmul %16, %18, %cst_13 {dimension_numbers = #tpu.dot_dimension_numbers<[1], [0], [0], [1], [0, 0, 1, 1], [], []>} : vector<128x4xf32>, vector<4x8xf32>, vector<128x8xf32> -> vector<128x8xf32>
    %20 = arith.addf %14, %19 : vector<128x8xf32>
    %21 = vector.extract_strided_slice %1 {offsets = [1, 0, 0], sizes = [8, 16, 4], strides = [1, 1, 1]} : vector<10x18x4xf32> to vector<8x16x4xf32>
    %22 = vector.shape_cast %21 : vector<8x16x4xf32> to vector<128x4xf32>
    %c3 = arith.constant 3 : index
    %c0_14 = arith.constant 0 : index
    %c0_15 = arith.constant 0 : index
    %23 = vector.load %arg3[%c3, %c0_14, %c0_15] : memref<9x4x8xf32, #tpu.memory_space<vmem>>, vector<1x4x8xf32>
    %24 = vector.shape_cast %23 : vector<1x4x8xf32> to vector<4x8xf32>
    %cst_16 = arith.constant dense<0.000000e+00> : vector<128x8xf32>
    %25 = tpu.matmul %22, %24, %cst_16 {dimension_numbers = #tpu.dot_dimension_numbers<[1], [0], [0], [1], [0, 0, 1, 1], [], []>} : vector<128x4xf32>, vector<4x8xf32>, vector<128x8xf32> -> vector<128x8xf32>
    %26 = arith.addf %20, %25 : vector<128x8xf32>
    %27 = vector.extract_strided_slice %1 {offsets = [1, 1, 0], sizes = [8, 16, 4], strides = [1, 1, 1]} : vector<10x18x4xf32> to vector<8x16x4xf32>
    %28 = vector.shape_cast %27 : vector<8x16x4xf32> to vector<128x4xf32>
    %c4 = arith.constant 4 : index
    %c0_17 = arith.constant 0 : index
    %c0_18 = arith.constant 0 : index
    %29 = vector.load %arg3[%c4, %c0_17, %c0_18] : memref<9x4x8xf32, #tpu.memory_space<vmem>>, vector<1x4x8xf32>
    %30 = vector.shape_cast %29 : vector<1x4x8xf32> to vector<4x8xf32>
    %cst_19 = arith.constant dense<0.000000e+00> : vector<128x8xf32>
    %31 = tpu.matmul %28, %30, %cst_19 {dimension_numbers = #tpu.dot_dimension_numbers<[1], [0], [0], [1], [0, 0, 1, 1], [], []>} : vector<128x4xf32>, vector<4x8xf32>, vector<128x8xf32> -> vector<128x8xf32>
    %32 = arith.addf %26, %31 : vector<128x8xf32>
    %33 = vector.extract_strided_slice %1 {offsets = [1, 2, 0], sizes = [8, 16, 4], strides = [1, 1, 1]} : vector<10x18x4xf32> to vector<8x16x4xf32>
    %34 = vector.shape_cast %33 : vector<8x16x4xf32> to vector<128x4xf32>
    %c5 = arith.constant 5 : index
    %c0_20 = arith.constant 0 : index
    %c0_21 = arith.constant 0 : index
    %35 = vector.load %arg3[%c5, %c0_20, %c0_21] : memref<9x4x8xf32, #tpu.memory_space<vmem>>, vector<1x4x8xf32>
    %36 = vector.shape_cast %35 : vector<1x4x8xf32> to vector<4x8xf32>
    %cst_22 = arith.constant dense<0.000000e+00> : vector<128x8xf32>
    %37 = tpu.matmul %34, %36, %cst_22 {dimension_numbers = #tpu.dot_dimension_numbers<[1], [0], [0], [1], [0, 0, 1, 1], [], []>} : vector<128x4xf32>, vector<4x8xf32>, vector<128x8xf32> -> vector<128x8xf32>
    %38 = arith.addf %32, %37 : vector<128x8xf32>
    %39 = vector.extract_strided_slice %1 {offsets = [2, 0, 0], sizes = [8, 16, 4], strides = [1, 1, 1]} : vector<10x18x4xf32> to vector<8x16x4xf32>
    %40 = vector.shape_cast %39 : vector<8x16x4xf32> to vector<128x4xf32>
    %c6 = arith.constant 6 : index
    %c0_23 = arith.constant 0 : index
    %c0_24 = arith.constant 0 : index
    %41 = vector.load %arg3[%c6, %c0_23, %c0_24] : memref<9x4x8xf32, #tpu.memory_space<vmem>>, vector<1x4x8xf32>
    %42 = vector.shape_cast %41 : vector<1x4x8xf32> to vector<4x8xf32>
    %cst_25 = arith.constant dense<0.000000e+00> : vector<128x8xf32>
    %43 = tpu.matmul %40, %42, %cst_25 {dimension_numbers = #tpu.dot_dimension_numbers<[1], [0], [0], [1], [0, 0, 1, 1], [], []>} : vector<128x4xf32>, vector<4x8xf32>, vector<128x8xf32> -> vector<128x8xf32>
    %44 = arith.addf %38, %43 : vector<128x8xf32>
    %45 = vector.extract_strided_slice %1 {offsets = [2, 1, 0], sizes = [8, 16, 4], strides = [1, 1, 1]} : vector<10x18x4xf32> to vector<8x16x4xf32>
    %46 = vector.shape_cast %45 : vector<8x16x4xf32> to vector<128x4xf32>
    %c7 = arith.constant 7 : index
    %c0_26 = arith.constant 0 : index
    %c0_27 = arith.constant 0 : index
    %47 = vector.load %arg3[%c7, %c0_26, %c0_27] : memref<9x4x8xf32, #tpu.memory_space<vmem>>, vector<1x4x8xf32>
    %48 = vector.shape_cast %47 : vector<1x4x8xf32> to vector<4x8xf32>
    %cst_28 = arith.constant dense<0.000000e+00> : vector<128x8xf32>
    %49 = tpu.matmul %46, %48, %cst_28 {dimension_numbers = #tpu.dot_dimension_numbers<[1], [0], [0], [1], [0, 0, 1, 1], [], []>} : vector<128x4xf32>, vector<4x8xf32>, vector<128x8xf32> -> vector<128x8xf32>
    %50 = arith.addf %44, %49 : vector<128x8xf32>
    %51 = vector.extract_strided_slice %1 {offsets = [2, 2, 0], sizes = [8, 16, 4], strides = [1, 1, 1]} : vector<10x18x4xf32> to vector<8x16x4xf32>
    %52 = vector.shape_cast %51 : vector<8x16x4xf32> to vector<128x4xf32>
    %c8 = arith.constant 8 : index
    %c0_29 = arith.constant 0 : index
    %c0_30 = arith.constant 0 : index
    %53 = vector.load %arg3[%c8, %c0_29, %c0_30] : memref<9x4x8xf32, #tpu.memory_space<vmem>>, vector<1x4x8xf32>
    %54 = vector.shape_cast %53 : vector<1x4x8xf32> to vector<4x8xf32>
    %cst_31 = arith.constant dense<0.000000e+00> : vector<128x8xf32>
    %55 = tpu.matmul %52, %54, %cst_31 {dimension_numbers = #tpu.dot_dimension_numbers<[1], [0], [0], [1], [0, 0, 1, 1], [], []>} : vector<128x4xf32>, vector<4x8xf32>, vector<128x8xf32> -> vector<128x8xf32>
    %56 = arith.addf %50, %55 : vector<128x8xf32>
    %c0_32 = arith.constant 0 : index
    %c0_33 = arith.constant 0 : index
    %57 = vector.load %arg4[%c0_32, %c0_33] : memref<1x8xf32, #tpu.memory_space<vmem>>, vector<1x8xf32>
    %58 = vector.broadcast %57 : vector<1x8xf32> to vector<128x8xf32>
    %59 = arith.addf %56, %58 : vector<128x8xf32>
    %60 = vector.shape_cast %59 : vector<128x8xf32> to vector<1x8x16x8xf32>
    %c0_34 = arith.constant 0 : index
    %c0_35 = arith.constant 0 : index
    %c0_36 = arith.constant 0 : index
    %c0_37 = arith.constant 0 : index
    %61 = vector.load %arg5[%c0_34, %c0_35, %c0_36, %c0_37] : memref<1x8x16x8xf32, #tpu.memory_space<vmem>>, vector<1x8x16x8xf32>
    tpu.vector_store %arg5[%c0_34, %c0_35, %c0_36, %c0_37], %60 {strides = array<i32>} : memref<1x8x16x8xf32, #tpu.memory_space<vmem>>, vector<1x8x16x8xf32>,
    %cst_38 = arith.constant dense<0.000000e+00> : vector<8xf32>
    %62 = vector.multi_reduction <add>, %59, %cst_38 [0] : vector<128x8xf32> to vector<8xf32>
    %63 = vector.shape_cast %62 : vector<8xf32> to vector<1x8xf32>
    %cst_39 = arith.constant 1.280000e+02 : f32
    %64 = vector.broadcast %cst_39 : f32 to vector<1x8xf32>
    %65 = arith.divf %63, %64 : vector<1x8xf32>
    %66 = vector.broadcast %65 : vector<1x8xf32> to vector<128x8xf32>
    %67 = arith.subf %59, %66 : vector<128x8xf32>
    %68 = arith.mulf %67, %67 : vector<128x8xf32>
    %cst_40 = arith.constant dense<0.000000e+00> : vector<8xf32>
    %69 = vector.multi_reduction <add>, %68, %cst_40 [0] : vector<128x8xf32> to vector<8xf32>
    %70 = vector.shape_cast %69 : vector<8xf32> to vector<1x8xf32>
    %71 = tpu.concatenate %63, %70 in 0 : vector<1x8xf32>, vector<1x8xf32> -> vector<2x8xf32>
    %72 = vector.shape_cast %71 : vector<2x8xf32> to vector<1x1x2x8xf32>
    %c0_41 = arith.constant 0 : index
    %c0_42 = arith.constant 0 : index
    %c0_43 = arith.constant 0 : index
    %c0_44 = arith.constant 0 : index
    %73 = vector.load %arg6[%c0_41, %c0_42, %c0_43, %c0_44] : memref<1x1x2x8xf32, #tpu.memory_space<vmem>>, vector<1x1x2x8xf32>
    tpu.vector_store %arg6[%c0_41, %c0_42, %c0_43, %c0_44], %72 {strides = array<i32>} : memref<1x1x2x8xf32, #tpu.memory_space<vmem>>, vector<1x1x2x8xf32>,
    return
  }
  func.func @transform_0(%arg0: i32, %arg1: i32) -> (i32, i32, i32, i32, i32) {
    %c0_i32 = arith.constant 0 : i32
    %c0_i32_0 = arith.constant 0 : i32
    %c0_i32_1 = arith.constant 0 : i32
    %c0_i32_2 = arith.constant 0 : i32
    return %arg0, %arg1, %c0_i32, %c0_i32_0, %c0_i32_1 : i32, i32, i32, i32, i32
  }
  func.func @transform_1(%arg0: i32, %arg1: i32) -> (i32, i32, i32) {
    %c0_i32 = arith.constant 0 : i32
    %c0_i32_0 = arith.constant 0 : i32
    %c0_i32_1 = arith.constant 0 : i32
    %c0_i32_2 = arith.constant 0 : i32
    return %c0_i32, %c0_i32_0, %c0_i32_1 : i32, i32, i32
  }
  func.func @transform_2(%arg0: i32, %arg1: i32) -> (i32, i32) {
    %c0_i32 = arith.constant 0 : i32
    %c0_i32_0 = arith.constant 0 : i32
    %c0_i32_1 = arith.constant 0 : i32
    return %c0_i32, %c0_i32_0 : i32, i32
  }
  func.func @transform_3(%arg0: i32, %arg1: i32) -> (i32, i32, i32, i32) {
    %c0_i32 = arith.constant 0 : i32
    %c0_i32_0 = arith.constant 0 : i32
    %c0_i32_1 = arith.constant 0 : i32
    return %arg0, %arg1, %c0_i32, %c0_i32_0 : i32, i32, i32, i32
  }
  func.func @transform_4(%arg0: i32, %arg1: i32) -> (i32, i32, i32, i32) {
    %c0_i32 = arith.constant 0 : i32
    %c0_i32_0 = arith.constant 0 : i32
    %c0_i32_1 = arith.constant 0 : i32
    return %arg0, %arg1, %c0_i32, %c0_i32_0 : i32, i32, i32, i32
  }
}

</mosaic_0001>

<bundles_post_ra>
// kernel: tpu_custom_call.1
= control target key start
LH: loop header
LB: loop body
LE: loop exit
PB: predicated region body
PF: predicated region fallthrough
CT: control target
= control target key end

     0   :  { %10 = vsyncpa [#allocation3], 0  ;;  %s4069_s0 = inlined_call_operand.vmem [shape: f32[2,2,10,18,4], index: 0, kind: input, shape index: {}]   ;;  %s4070_s1 = inlined_call_operand.vmem [shape: f32[9,4,8], index: 1, kind: input, shape index: {}]   ;;  %s4071_s2 = inlined_call_operand.vmem [shape: f32[1,8], index: 2, kind: input, shape index: {}]   ;;  %s4072_s3 = inlined_call_operand.vmem [shape: f32[2,16,16,8], index: 3, kind: output, shape index: {0}]   ;;  %s4073_s4 = inlined_call_operand.hbm [shape: f32[2,2,2,8], index: 4, kind: output, shape index: {1}]  }
   0x1   :  { %12 = vsyncpa [#allocation3 + $0x1], 0  ;;  %s3190_s15 = smov 0   ;;  %s3192_s16 = smov 0  }
   0x2   :  { %s3194_s17 = smov 0   ;;  %s3196_s18 = smov 0  }
   0x3   :  { %s3198_s19 = smov 0   ;;  %s3200_s20 = smov 0  }
   0x4   :  { %s3202_s21 = smov 0   ;;  %s3204_s22 = smov 0  }
   0x5 LB: > { %s2300_s23 = sadd.s32 4294967295, %s3162_s22   ;;  %s2301_s24 = sadd.s32 4294967294, %s3162_s22   ;;  %s3162_s22 = sphi %s3204_s22, %s18_s22   ;;  %s3158_s21 = sphi %s3202_s21, %s4082_s21   ;;  %s3154_s20 = sphi %s3200_s20, %s4081_s20   ;;  %s3150_s19 = sphi %s3198_s19, %s4080_s19   ;;  %s3146_s18 = sphi %s3196_s18, %s4079_s18   ;;  %s3142_s17 = sphi %s3194_s17, %s4078_s17   ;;  %s3138_s16 = sphi %s3192_s16, %s4077_s16   ;;  %s3134_s15 = sphi %s3190_s15, %s4076_s15  }
   0x6   : > { %s27_s25 = sadd.s32 1, %s3154_s20  ;;  %s30_s26 = sadd.s32 1, %s3158_s21 }
   0x7   : > { %p28_p0 = scmp.ge.s32.totalorder %s27_s25, 2  ;;  %p147_p1 = scmp.ne.s32.totalorder %s3142_s17, %s3138_s16 }
   0x8   : > { %p148_p2 = scmp.eq.s32.totalorder %s2300_s23, 3  ;;  %p153_p5 = scmp.ne.s32.totalorder %s3138_s16, %s3134_s15 }
   0x9   : > { %s4084_s25 = smov (%p28_p0, %s27_s25), 0  ;;  %s4086_s26 = smov (!%p28_p0, %s30_s26), %s3158_s21 }
   0xa   : > { %s133_s27 = ssub.s32 %s3154_s20, %s4084_s25  ;;  %p3241_p3 = por %p148_p2, %p147_p1 }
   0xb   : > { %p32_p4 = scmp.ge.s32.totalorder %s4086_s26, 2  ;;  %p154_p6 = scmp.eq.s32.totalorder %s2301_s24, 3 }
   0xc   : > { %p2304_p7 = scmp.ge.s32.totalorder %s3162_s22, 1  ;;  %p190_p9 = scmp.lt.s32.totalorder %s3162_s22, 5 }
   0xd   : > { %s4088_s26 = smov (%p32_p4, %s4086_s26), 0  ;;  %p3250_p8 = por %p154_p6, %p153_p5 }
   0xe   : > { %s132_s30 = ssub.s32 %s3158_s21, %s4088_s26  ;;  %s137_s5 = sadd.s32 1, %s3142_s17 }
   0xf   : > { %s134_s6 = sor.u32 %s133_s27, %s132_s30  ;;  %p191_p10 = pnand %p2304_p7, %p190_p9 }
  0x10   : > { %p135_p11 = scmp.eq.s32.totalorder %s134_s6, 0  ;;  %v2311_v0 = vld [vmem:[%s4070_s1 + $0x4] sm:$0xf] (!%p191_p10)  ;;  %vm381_vm0 = vcmask (!%p191_p10), 1043456   ;;  %v3267_v1 = vld [vmem:[%s4070_s1 + $0x10] sm:$0xf] (!%p191_p10) }
  0x11   : > { %194 = sbr.rel (%p191_p10) target bundleno = 480 (0x1e0), region = 32  ;;  %p230_p12 = scmp.lt.s32.totalorder (!%p191_p10), %s3150_s19, 1  ;;  %2631 = vmatprep.subr.msk.mxu1 (!%p191_p10), %vm381_vm0, %v2311_v0  ;;  %2735 = vmatprep.subr.msk.mxu0 (!%p191_p10), %vm381_vm0, %v3267_v1  ;;  %v280_v2 = vld [vmem:[%s4070_s1] sm:$0xf] (!%p191_p10)  ;;  %v2400_v3 = vld [vmem:[%s4070_s1 + $0x14] sm:$0xf] (!%p191_p10) }
  0x12   : > { %s3259_s7 = scalar_select %p135_p11, %s3142_s17, %s137_s5  }
  0x13   : > { %p232_p13 = scmp.lt.s32.totalorder (!%p191_p10), %s3146_s18, 1  ;;  %2632 = vmatpush3.msk.msra.mxu1 (!%p191_p10), %vm381_vm0, %v2311_v0  ;;  %2736 = vmatpush3.msk.msra.mxu0 (!%p191_p10), %vm381_vm0, %v3267_v1  ;;  %vm305_vm1 = vcmask (!%p191_p10), 1046528   ;;  %vm348_vm2 = vcmask (!%p191_p10), 31744   ;;  %v3358_v33 = vld [vmem:[%s4070_s1 + $0x18] sm:$0xf] (!%p191_p10)  ;;  %vm710_vm3 = vcmask (!%p191_p10), 1045504  }
  0x14   : > { %2657 = vmatprep.subr.msk.mxu1 (!%p191_p10), %vm381_vm0, %v280_v2  ;;  %2761 = vmatprep.subr.msk.mxu0 (!%p191_p10), %vm381_vm0, %v2400_v3  ;;  %v3368_v35 = vld [vmem:[%s4070_s1 + $0x8] sm:$0xf] (!%p191_p10)  ;;  %s2307_s10 = sshll.u32 (!%p191_p10), %s3146_s18, 3  ;;  %vm2018_vm4 = vcmask (!%p191_p10), 64512   ;;  %s2474_s9 = sshll.u32 (!%p191_p10), %s3150_s19, 1  ;;  %vm2143_vm5 = vcmask (!%p191_p10), 1040384  }
  0x15   : > { %p242_p0 = scmp.lt.s32.totalorder (!%p191_p10), %s2307_s10, 15  ;;  %vm2145_vm6 = vcmask (!%p191_p10), 58368  }
  0x18   : > { %s3281_s14 = scalar_select %p230_p12, %s3150_s19, 1 }
  0x19   : > { %s233_s27 = scalar_select %p232_p13, %s3146_s18, 1 }
  0x1a   : > { %s2996_s30 = smul.u32 60, %s3281_s14  ;;  %s4090_s10 = smov (!%p242_p0, %s2307_s10), 15 }
  0x1b   : > { %s2995_s5 = smul.u32 30, %s233_s27  ;;  %s2309_s12 = sshll.u32 %s3281_s14, 5 }
  0x1c   : > { %s227_s14 = sand.u32 1, %s3138_s16  }
  0x1d   : > { %s236_s6 = sadd.s32 %s2996_s30, %s2995_s5  ;;  %s3164_s30 = smov [#allocation2]  }
  0x1e   : > { %s2306_s8 = sshll.u32 %s236_s6, 3  ;;  %s3072_s5 = sshll.u32 %s3164_s30, 4  ;;  %s3073_s5 = int_to_ptr.vmem [resolvable:$false] %s3072_s5 }
  0x1f   : > { %s3293_s11 = scalar_lea.vmem %s4069_s0, %s2306_s8  ;;  %s2305_s8 = sshll.u32 %s227_s14, 1 }
  0x20   : > { %v3296_v4 = vld [vmem:[%s3293_s11] sm:$0xff]  ;;  %v3299_v5 = vld [vmem:[%s3293_s11 + $0x8] sm:$0xff]  ;;  %v3302_v6 = vld [vmem:[%s3293_s11 + $0x18] sm:$0xff] }
  0x21   : > { %v306_v7 = vrot.slane %v3296_v4, 1  ;;  %v307_v8 = vrot.slane %v3299_v5, 1  ;;  %v3307_v9 = vld [vmem:[%s3293_s11 + $0x20] sm:$0xff]  ;;  %v311_v10 = vrot.slane %v3302_v6, 1  ;;  %v3311_v11 = vld [vmem:[%s3293_s11 + $0x10] sm:$0x3] }
  0x22   : > { %v312_v12 = vrot.slane %v3307_v9, 1  ;;  %v309_v13 = vrot.slane %v3311_v11, 1  ;;  %v3316_v14 = vld [vmem:[%s3293_s11 + $0x28] sm:$0x3]  ;;  %v3319_v15 = vld [vmem:[%s3293_s11 + $0x30] sm:$0xff]  ;;  %v3324_v18 = vld [vmem:[%s3293_s11 + $0x38] sm:$0xff] }
  0x23   : > { %v308_v16 = vsel %vm305_vm1, %v306_v7, %v307_v8  ;;  %v314_v17 = vrot.slane %v3316_v14, 1  ;;  %v316_v19 = vrot.slane %v3319_v15, 1  ;;  %v3328_v20 = vld [vmem:[%s3293_s11 + $0x40] sm:$0x3]  ;;  %v317_v23 = vrot.slane %v3324_v18, 1  ;;  %v3336_v25 = vld [vmem:[%s3293_s11 + $0x48] sm:$0xff] }
  0x24   : > { %2633 = vmatprep.mubr.msk.f32.mxu1 %vm348_vm2, %v308_v16  ;;  %v313_v21 = vsel %vm305_vm1, %v311_v10, %v312_v12  ;;  %v310_v22 = vsel %vm305_vm1, %v307_v8, %v309_v13  ;;  %v319_v24 = vrot.slane %v3328_v20, 1  ;;  %v3339_v26 = vld [vmem:[%s3293_s11 + $0x50] sm:$0xff]  ;;  %v3342_v27 = vld [vmem:[%s3293_s11 + $0x58] sm:$0x3]  ;;  %v321_v29 = vrot.slane %v3336_v25, 1  ;;  %v3350_v31 = vld [vmem:[%s3293_s11 + $0x60] sm:$0xff] }
  0x25   : > { %2737 = vmatprep.mubr.msk.f32.mxu0 %vm348_vm2, %v313_v21  ;;  %2634 = vmatmul.mubr.msk.f32.vlgmr.msra.gmra.mrb[0].mxu1 %vm348_vm2, %v310_v22  ;;  %v315_v28 = vsel %vm305_vm1, %v312_v12, %v314_v17  ;;  %v322_v30 = vrot.slane %v3339_v26, 1  ;;  %v3353_v32 = vld [vmem:[%s3293_s11 + $0x68] sm:$0xff]  ;;  %v3363_v34 = vsel %vm305_vm1, %v316_v19, %v317_v23  ;;  %v324_v37 = vrot.slane %v3342_v27, 1  ;;  %v3384_v41 = vld [vmem:[%s3293_s11 + $0x70] sm:$0x3]  ;;  %v3407_v47 = vld [vmem:[%s3293_s11 + $0x78] sm:$0xff] }
  0x26   : > { %2658 = vmatpush3.msk.msra.mxu1 %vm381_vm0, %v280_v2  ;;  %2738 = vmatmul.mubr.msk.f32.vlgmr.msra.gmra.mrb[0].mxu0 %vm348_vm2, %v315_v28  ;;  %v3373_v36 = vsel %vm305_vm1, %v317_v23, %v319_v24  ;;  %v326_v39 = vrot.slane %v3350_v31, 1  ;;  %v327_v40 = vrot.slane %v3353_v32, 1  ;;  %v329_v43 = vrot.slane %v3384_v41, 1  ;;  %v3410_v48 = vld [vmem:[%s3293_s11 + $0x80] sm:$0xff]  ;;  %v3419_v49 = vld [vmem:[%s3293_s11 + $0x88] sm:$0x3] }
  0x27   : > { %2762 = vmatpush3.msk.msra.mxu0 %vm381_vm0, %v2400_v3  ;;  %2636 = vmatprep.mubr.msk.f32.mxu1 %vm348_vm2, %v313_v21  ;;  %v3379_v38 = vsel %vm305_vm1, %v321_v29, %v322_v30  ;;  %v3398_v42 = vsel %vm305_vm1, %v322_v30, %v324_v37  ;;  %v716_v45 = vrot.slane %v3302_v6, 2  ;;  %v717_v46 = vrot.slane %v3307_v9, 2  ;;  %v3430_v54 = vld [vmem:[%s3293_s11 + $0x90] sm:$0xff]  ;;  %v3433_v55 = vld [vmem:[%s3293_s11 + $0x98] sm:$0xff]  ;;  %v3451_v63 = vld [vmem:[%s3293_s11 + $0xa0] sm:$0x3] }
  0x28   : > { %2740 = vmatprep.mubr.msk.f32.mxu0 %vm348_vm2, %v3363_v34  ;;  %2787 = vmatprep.subr.msk.mxu0 %vm381_vm0, %v3358_v33  ;;  %v3402_v44 = vsel %vm305_vm1, %v326_v39, %v327_v40  ;;  %v719_v50 = vrot.slane %v3316_v14, 2  ;;  %v3425_v51 = vsel %vm305_vm1, %v327_v40, %v329_v43  ;;  %v331_v52 = vrot.slane %v3407_v47, 1  ;;  %v3466_v8 = vld [vmem:[%s4070_s1 + $0x1c] sm:$0xf]  ;;  %v3472_v12 = vld [vmem:[%s3293_s11 + $0xa8] sm:$0xff]  ;;  %v3475_v13 = vld [vmem:[%s3293_s11 + $0xb0] sm:$0xff] }
  0x29   : > { %2637 = vmatmul.mubr.msk.f32.gmra.mrb[2].mxu1 %vm348_vm2, %v315_v28  ;;  %2683 = vmatprep.subr.msk.mxu1 %vm381_vm0, %v3368_v35  ;;  %v332_v53 = vrot.slane %v3410_v48, 1  ;;  %v3436_v56 = vsel %vm710_vm3, %v716_v45, %v717_v46  ;;  %v721_v57 = vrot.slane %v3319_v15, 2  ;;  %v722_v58 = vrot.slane %v3324_v18, 2  ;;  %v3478_v14 = vld [vmem:[%s3293_s11 + $0xd8] sm:$0xff]  ;;  %v3491_v21 = vld [vmem:[%s3293_s11 + $0xe0] sm:$0xff] }
  0x2a   : > { %2741 = vmatmul.mubr.msk.f32.gmra.mrb[2].mxu0 %vm348_vm2, %v3373_v36  ;;  %2639 = vmatprep.mubr.msk.f32.mxu1 %vm348_vm2, %v3363_v34  ;;  %v334_v59 = vrot.slane %v3419_v49, 1  ;;  %v724_v60 = vrot.slane %v3328_v20, 2  ;;  %v336_v61 = vrot.slane %v3430_v54, 1  ;;  %v337_v62 = vrot.slane %v3433_v55, 1  ;;  %v279_v22 = vld [vmem:[%s3293_s11 + $0xe8] sm:$0x3] }
  0x2b   : > { %2743 = vmatprep.mubr.msk.f32.mxu0 %vm348_vm2, %v3379_v38  ;;  %v3456_v0 = vsel %vm710_vm3, %v717_v46, %v719_v50  ;;  %v3459_v2 = vsel %vm305_vm1, %v331_v52, %v332_v53  ;;  %v726_v3 = vrot.slane %v3336_v25, 2  ;;  %v727_v7 = vrot.slane %v3339_v26, 2  ;;  %v3514_v40 = vld [vmem:[%s3293_s11 + $0xb8] sm:$0x3] }
  0x2c   : > { %v3469_v10 = vsel %vm710_vm3, %v721_v57, %v722_v58  ;;  %v3483_v16 = vsel %vm305_vm1, %v332_v53, %v334_v59  ;;  %v3486_v17 = vsel %vm710_vm3, %v722_v58, %v724_v60  ;;  %v339_v19 = vrot.slane %v3451_v63, 1 }
  0x2d   : > { %2640 = vmatmul.mubr.msk.f32.gmra.mrb[4].mxu1 %vm348_vm2, %v3373_v36  ;;  %v1645_v20 = vrot.slane %v3478_v14, 1  ;;  %v3499_v23 = vsel %vm305_vm1, %v336_v61, %v337_v62  ;;  %v729_v24 = vrot.slane %v3342_v27, 2  ;;  %v1820_v28 = vrot.slane %v3478_v14, 2 }
  0x2e   : > { %2744 = vmatmul.mubr.msk.f32.gmra.mrb[4].mxu0 %vm348_vm2, %v3398_v42  ;;  %2642 = vmatprep.mubr.msk.f32.mxu1 %vm348_vm2, %v3379_v38  ;;  %v1646_v29 = vrot.slane %v3491_v21, 1  ;;  %v3509_v30 = vsel %vm710_vm3, %v726_v3, %v727_v7  ;;  %v341_v37 = vrot.slane %v3472_v12, 1  ;;  %v342_v39 = vrot.slane %v3475_v13, 1 }
  0x2f   : > { %2746 = vmatprep.mubr.msk.f32.mxu0 %vm348_vm2, %v3402_v44  ;;  %v1821_v27 = vrot.slane %v3491_v21, 2  ;;  %v731_v43 = vrot.slane %v3350_v31, 2  ;;  %v732_v45 = vrot.slane %v3353_v32, 2  ;;  %v1648_v46 = vrot.slane %v279_v22, 1 }
  0x30   : > { %v1823_v52 = vrot.slane %v279_v22, 2  ;;  %v3534_v53 = vsel %vm305_vm1, %v337_v62, %v339_v19  ;;  %v344_v57 = vrot.slane %v3514_v40, 1  ;;  %v3543_v59 = vsel %vm710_vm3, %v727_v7, %v729_v24 }
  0x31   : > { %2643 = vmatmul.mubr.msk.f32.gmra.mrb[6].mxu1 %vm348_vm2, %v3398_v42  ;;  %v3527_v50 = vsel %vm710_vm3, %v1820_v28, %v1821_v27  ;;  %v3538_v58 = vsel %vm305_vm1, %v1646_v29, %v1648_v46  ;;  %v3546_v60 = vsel %vm305_vm1, %v341_v37, %v342_v39  ;;  %v734_v61 = vrot.slane %v3384_v41, 2  ;;  %v3600_v46 = vld [vmem:[%s3293_s11 + $0xc8] sm:$0xff] }
  0x32   : > { %2747 = vmatmul.mubr.msk.f32.gmra.mrb[6].mxu0 %vm348_vm2, %v3425_v51  ;;  %2645 = vmatprep.mubr.msk.f32.mxu1 %vm348_vm2, %v3402_v44  ;;  %v3550_v3 = vsel %vm710_vm3, %v1821_v27, %v1823_v52  ;;  %v3553_v62 = vsel %vm710_vm3, %v731_v43, %v732_v45  ;;  %v736_v19 = vrot.slane %v3407_v47, 2  ;;  %v3564_v41 = vsel %vm305_vm1, %v342_v39, %v344_v57  ;;  %v2364_v52 = vld [vmem:[%s4070_s1 + $0xc] sm:$0xf] }
  0x33   : > { %2763 = vmatprep.mubr.msk.f32.mxu0 %vm348_vm2, %v3436_v56  ;;  %v3569_v7 = vsel %vm710_vm3, %v732_v45, %v734_v61  ;;  %v739_v22 = vrot.slane %v3419_v49, 2  ;;  %v741_v28 = vrot.slane %v3430_v54, 2  ;;  %v744_v37 = vrot.slane %v3451_v63, 2  ;;  %v3597_v45 = vld [vmem:[%s3293_s11 + $0xc0] sm:$0xff] }
  0x34   : > { %v746_v27 = vrot.slane %v3472_v12, 2  ;;  %v747_v43 = vrot.slane %v3475_v13, 2  ;;  %v749_v57 = vrot.slane %v3514_v40, 2 }
  0x35   : > { %2646 = vmatmul.mubr.msk.f32.gmra.mrb[8].mxu1 %vm348_vm2, %v3425_v51 }
  0x36   : > { %2764 = vmatmul.mubr.msk.f32.vlgmr.msra.gmra.mrb[0].mxu0 %vm348_vm2, %v3456_v0  ;;  %2648 = vmatprep.mubr.msk.f32.mxu1 %vm348_vm2, %v3459_v2  ;;  %v3618_v61 = vsel %vm710_vm3, %v746_v27, %v747_v43  ;;  %v3635_v40 = vsel %vm710_vm3, %v747_v43, %v749_v57  ;;  %v711_v27 = vrot.slane %v3296_v4, 2  ;;  %v714_v43 = vrot.slane %v3311_v11, 2 }
  0x37   : > { %2788 = vmatpush3.msk.msra.mxu0 %vm381_vm0, %v3358_v33  ;;  %2766 = vmatprep.mubr.msk.f32.mxu0 %vm348_vm2, %v3469_v10  ;;  %v3522_v33 = vsel %vm305_vm1, %v1645_v20, %v1646_v29  ;;  %v737_v20 = vrot.slane %v3410_v48, 2  ;;  %v742_v29 = vrot.slane %v3433_v55, 2  ;;  %v1123_v11 = vrot.slane %v3600_v46, 1 }
  0x38   : > { %2813 = vmatprep.subr.msk.mxu0 %vm381_vm0, %v3466_v8 }
  0x39   : > { %2649 = vmatmul.mubr.msk.f32.gmra.mrb[10].mxu1 %vm348_vm2, %v3483_v16  ;;  %v3573_v24 = vsel %vm710_vm3, %v736_v19, %v737_v20  ;;  %v3586_v49 = vsel %vm710_vm3, %v737_v20, %v739_v22  ;;  %v3590_v39 = vsel %vm710_vm3, %v741_v28, %v742_v29  ;;  %v3614_v63 = vsel %vm710_vm3, %v742_v29, %v744_v37  ;;  %v3623_v20 = vld [vmem:[%s3293_s11 + $0xd0] sm:$0x3]  ;;  %v2454_v37 = vld [vmem:[%s4070_s1 + $0x20] sm:$0xf]  ;;  %s2308_s11 = sshll.u32 %s4090_s10, 1  ;;  %s2173_s10 = sadd.s32 %s3146_s18, %s2474_s9 }
  0x3a   : > { %2767 = vmatmul.mubr.msk.f32.gmra.mrb[2].mxu0 %vm348_vm2, %v3486_v17  ;;  %2651 = vmatprep.mubr.msk.f32.mxu1 %vm348_vm2, %v3499_v23  ;;  %v1297_v19 = vrot.slane %v3597_v45, 2  ;;  %v1300_v22 = vrot.slane %v3623_v20, 2  ;;  %s246_s13 = sadd.s32 %s2309_s12, %s2308_s11  ;;  %s2475_s11 = sshll.u32 %s2173_s10, 5 }
  0x3b   : > { %2769 = vmatprep.mubr.msk.f32.mxu0 %vm348_vm2, %v3509_v30  ;;  %s2310_s23 = sshll.u32 %s246_s13, 3  ;;  %s229_s12 = scalar_lea.vmem [#allocation2], %s2305_s8 }
  0x3c   : > { %s3874_s6 = scalar_lea.vmem %s4072_s3, %s2310_s23  ;;  %s2177_s13 = sshll.u32 %s229_s12, 4  ;;  %s4017_s13 = int_to_ptr.vmem [resolvable:$true] %s2177_s13 }
  0x3d   : > { %2652 = vmatmul.mubr.msk.f32.gmra.mrb[12].mxu1 %vm348_vm2, %v3534_v53  ;;  %s4015_s27 = scalar_lea.hbm %s4073_s4, %s2475_s11  ;;  %s2158_s18 = scalar_lea.sflag [#allocation3], %s227_s14 }
  0x3e   : > { %2770 = vmatmul.mubr.msk.f32.gmra.mrb[4].mxu0 %vm348_vm2, %v3543_v59  ;;  %2654 = vmatprep.mubr.msk.f32.mxu1 %vm348_vm2, %v3546_v60  ;;  %s3068_s19 = scalar_lea.vmem %s4017_s13, 32  ;;  %p3075_p5 = scmp.lt.s32.totalorder %s4017_s13, %s3073_s5 }
  0x3f   : > { %2772 = vmatprep.mubr.msk.f32.mxu0 %vm348_vm2, %v3553_v62  ;;  %p3069_p1 = scmp.ne.s32.totalorder %s4017_s13, %s3068_s19 }
  0x41   : > { %2655 = vmatmul.mubr.msk.f32.gmra.mrb[14].mxu1 %vm348_vm2, %v3564_v41  ;;  %p3070_p2 = pnand %p3069_p1, %p3241_p3 }
  0x42   : > { %2773 = vmatmul.mubr.msk.f32.gmra.mrb[6].mxu0 %vm348_vm2, %v3569_v7  ;;  %2659 = vmatprep.mubr.msk.f32.mxu1 %vm348_vm2, %v3296_v4 }
  0x43   : > { %2775 = vmatprep.mubr.msk.f32.mxu0 %vm348_vm2, %v3573_v24  ;;  %p3071_p4 = pneg %p3070_p2 }
  0x45   : > { %2660 = vmatmul.mubr.msk.f32.vlgmr.msra.gmra.mrb[0].mxu1 %vm348_vm2, %v3299_v5 }
  0x46   : > { %2684 = vmatpush3.msk.msra.mxu1 %vm381_vm0, %v3368_v35  ;;  %2776 = vmatmul.mubr.msk.f32.gmra.mrb[8].mxu0 %vm348_vm2, %v3586_v49  ;;  %v1298_v35 = vrot.slane %v3600_v46, 2 }
  0x47   : > { %2662 = vmatprep.mubr.msk.f32.mxu1 %vm348_vm2, %v3302_v6  ;;  %2778 = vmatprep.mubr.msk.f32.mxu0 %vm348_vm2, %v3590_v39 }
  0x48   : > { %2709 = vmatprep.subr.msk.mxu1 %vm381_vm0, %v2364_v52  ;;  %v3639_v28 = vsel %vm710_vm3, %v1297_v19, %v1298_v35  ;;  %v3650_v29 = vsel %vm710_vm3, %v1298_v35, %v1300_v22 }
  0x49   : > { %2663 = vmatmul.mubr.msk.f32.gmra.mrb[2].mxu1 %vm348_vm2, %v3307_v9 }
  0x4a   : > { %2779 = vmatmul.mubr.msk.f32.gmra.mrb[10].mxu0 %vm348_vm2, %v3614_v63  ;;  %2665 = vmatprep.mubr.msk.f32.mxu1 %vm348_vm2, %v3319_v15 }
  0x4b   : > { %2781 = vmatprep.mubr.msk.f32.mxu0 %vm348_vm2, %v3618_v61 }
  0x4d   : > { %2666 = vmatmul.mubr.msk.f32.gmra.mrb[4].mxu1 %vm348_vm2, %v3324_v18 }
  0x4e   : > { %2782 = vmatmul.mubr.msk.f32.gmra.mrb[12].mxu0 %vm348_vm2, %v3635_v40  ;;  %2668 = vmatprep.mubr.msk.f32.mxu1 %vm348_vm2, %v3336_v25 }
  0x4f   : > { %2784 = vmatprep.mubr.msk.f32.mxu0 %vm348_vm2, %v3639_v28 }
  0x51   : > { %2669 = vmatmul.mubr.msk.f32.gmra.mrb[6].mxu1 %vm348_vm2, %v3339_v26 }
  0x52   : > { %2785 = vmatmul.mubr.msk.f32.gmra.mrb[14].mxu0 %vm348_vm2, %v3650_v29  ;;  %2671 = vmatprep.mubr.msk.f32.mxu1 %vm348_vm2, %v3350_v31 }
  0x53   : > { %2789 = vmatprep.mubr.msk.f32.mxu0 %vm348_vm2, %v3319_v15 }
  0x55   : > { %2672 = vmatmul.mubr.msk.f32.gmra.mrb[8].mxu1 %vm348_vm2, %v3353_v32 }
  0x56   : > { %2790 = vmatmul.mubr.msk.f32.vlgmr.msra.gmra.mrb[0].mxu0 %vm348_vm2, %v3324_v18  ;;  %2674 = vmatprep.mubr.msk.f32.mxu1 %vm348_vm2, %v3407_v47 }
  0x57   : > { %2814 = vmatpush3.msk.msra.mxu0 %vm381_vm0, %v3466_v8  ;;  %2792 = vmatprep.mubr.msk.f32.mxu0 %vm348_vm2, %v3336_v25  ;;  %v712_v8 = vrot.slane %v3299_v5, 2  ;;  %v1122_v5 = vrot.slane %v3597_v45, 1 }
  0x58   : > { %2839 = vmatprep.subr.msk.mxu0 %vm381_vm0, %v2454_v37 }
  0x59   : > { %2675 = vmatmul.mubr.msk.f32.gmra.mrb[10].mxu1 %vm348_vm2, %v3410_v48  ;;  %v713_v57 = vsel %vm710_vm3, %v711_v27, %v712_v8  ;;  %v715_v4 = vsel %vm710_vm3, %v712_v8, %v714_v43 }
  0x5a   : > { %2793 = vmatmul.mubr.msk.f32.gmra.mrb[2].mxu0 %vm348_vm2, %v3339_v26  ;;  %2677 = vmatprep.mubr.msk.f32.mxu1 %vm348_vm2, %v3430_v54 }
  0x5b   : > { %2795 = vmatprep.mubr.msk.f32.mxu0 %vm348_vm2, %v3350_v31 }
  0x5d   : > { %2678 = vmatmul.mubr.msk.f32.gmra.mrb[12].mxu1 %vm348_vm2, %v3433_v55 }
  0x5e   : > { %2796 = vmatmul.mubr.msk.f32.gmra.mrb[4].mxu0 %vm348_vm2, %v3353_v32  ;;  %2680 = vmatprep.mubr.msk.f32.mxu1 %vm348_vm2, %v3472_v12 }
  0x5f   : > { %2798 = vmatprep.mubr.msk.f32.mxu0 %vm348_vm2, %v3407_v47 }
  0x61   : > { %2681 = vmatmul.mubr.msk.f32.gmra.mrb[14].mxu1 %vm348_vm2, %v3475_v13 }
  0x62   : > { %2799 = vmatmul.mubr.msk.f32.gmra.mrb[6].mxu0 %vm348_vm2, %v3410_v48  ;;  %2685 = vmatprep.mubr.msk.f32.mxu1 %vm348_vm2, %v713_v57 }
  0x63   : > { %2801 = vmatprep.mubr.msk.f32.mxu0 %vm348_vm2, %v3430_v54 }
  0x65   : > { %2686 = vmatmul.mubr.msk.f32.vlgmr.msra.gmra.mrb[0].mxu1 %vm348_vm2, %v715_v4 }
  0x66   : > { %2710 = vmatpush3.msk.msra.mxu1 %vm381_vm0, %v2364_v52  ;;  %2802 = vmatmul.mubr.msk.f32.gmra.mrb[8].mxu0 %vm348_vm2, %v3433_v55 }
  0x67   : > { %2688 = vmatprep.mubr.msk.f32.mxu1 %vm348_vm2, %v3436_v56  ;;  %2804 = vmatprep.mubr.msk.f32.mxu0 %vm348_vm2, %v3472_v12 }
  0x68   : > { %2865 = vmatprep.subr.msk.mxu1 %vm381_vm0, %v3267_v1 }
  0x69   : > { %2689 = vmatmul.mubr.msk.f32.gmra.mrb[2].mxu1 %vm348_vm2, %v3456_v0 }
  0x6a   : > { %2805 = vmatmul.mubr.msk.f32.gmra.mrb[10].mxu0 %vm348_vm2, %v3475_v13  ;;  %2691 = vmatprep.mubr.msk.f32.mxu1 %vm348_vm2, %v3469_v10 }
  0x6b   : > { %2807 = vmatprep.mubr.msk.f32.mxu0 %vm348_vm2, %v3597_v45 }
  0x6d   : > { %2692 = vmatmul.mubr.msk.f32.gmra.mrb[4].mxu1 %vm348_vm2, %v3486_v17 }
  0x6e   : > { %2808 = vmatmul.mubr.msk.f32.gmra.mrb[12].mxu0 %vm348_vm2, %v3600_v46  ;;  %2694 = vmatprep.mubr.msk.f32.mxu1 %vm348_vm2, %v3509_v30 }
  0x6f   : > { %2810 = vmatprep.mubr.msk.f32.mxu0 %vm348_vm2, %v3478_v14 }
  0x71   : > { %2695 = vmatmul.mubr.msk.f32.gmra.mrb[6].mxu1 %vm348_vm2, %v3543_v59 }
  0x72   : > { %2811 = vmatmul.mubr.msk.f32.gmra.mrb[14].mxu0 %vm348_vm2, %v3491_v21  ;;  %2697 = vmatprep.mubr.msk.f32.mxu1 %vm348_vm2, %v3553_v62 }
  0x73   : > { %2815 = vmatprep.mubr.msk.f32.mxu0 %vm348_vm2, %v3363_v34  ;;  %v1124_v34 = vsel %vm305_vm1, %v1122_v5, %v1123_v11 }
  0x75   : > { %2698 = vmatmul.mubr.msk.f32.gmra.mrb[8].mxu1 %vm348_vm2, %v3569_v7 }
  0x76   : > { %2816 = vmatmul.mubr.msk.f32.vlgmr.msra.gmra.mrb[0].mxu0 %vm348_vm2, %v3373_v36  ;;  %2700 = vmatprep.mubr.msk.f32.mxu1 %vm348_vm2, %v3573_v24 }
  0x77   : > { %2840 = vmatpush3.msk.msra.mxu0 %vm381_vm0, %v2454_v37  ;;  %2818 = vmatprep.mubr.msk.f32.mxu0 %vm348_vm2, %v3379_v38 }
  0x79   : > { %2701 = vmatmul.mubr.msk.f32.gmra.mrb[10].mxu1 %vm348_vm2, %v3586_v49 }
  0x7a   : > { %2819 = vmatmul.mubr.msk.f32.gmra.mrb[2].mxu0 %vm348_vm2, %v3398_v42  ;;  %2703 = vmatprep.mubr.msk.f32.mxu1 %vm348_vm2, %v3590_v39  ;;  %v3869_v42 = vld [vmem:[%s4071_s2] ss:$0 sm:$0xff] }
  0x7b   : > { %2821 = vmatprep.mubr.msk.f32.mxu0 %vm348_vm2, %v3402_v44 }
  0x7d   : > { %2704 = vmatmul.mubr.msk.f32.gmra.mrb[12].mxu1 %vm348_vm2, %v3614_v63 }
  0x7e   : > { %2822 = vmatmul.mubr.msk.f32.gmra.mrb[4].mxu0 %vm348_vm2, %v3425_v51  ;;  %2706 = vmatprep.mubr.msk.f32.mxu1 %vm348_vm2, %v3618_v61 }
  0x7f   : > { %2824 = vmatprep.mubr.msk.f32.mxu0 %vm348_vm2, %v3459_v2 }
  0x81   : > { %2707 = vmatmul.mubr.msk.f32.gmra.mrb[14].mxu1 %vm348_vm2, %v3635_v40 }
  0x82   : > { %2825 = vmatmul.mubr.msk.f32.gmra.mrb[6].mxu0 %vm348_vm2, %v3483_v16  ;;  %2711 = vmatprep.mubr.msk.f32.mxu1 %vm348_vm2, %v3302_v6  ;;  %v1125_v6 = vrot.slane %v3623_v20, 1 }
  0x83   : > { %2827 = vmatprep.mubr.msk.f32.mxu0 %vm348_vm2, %v3499_v23 }
  0x85   : > { %2712 = vmatmul.mubr.msk.f32.vlgmr.msra.gmra.mrb[0].mxu1 %vm348_vm2, %v3307_v9 }
  0x86   : > { %2866 = vmatpush3.msk.msra.mxu1 %vm381_vm0, %v3267_v1  ;;  %2828 = vmatmul.mubr.msk.f32.gmra.mrb[8].mxu0 %vm348_vm2, %v3534_v53  ;;  %v1126_v1 = vsel %vm305_vm1, %v1123_v11, %v1125_v6 }
  0x87   : > { %2714 = vmatprep.mubr.msk.f32.mxu1 %vm348_vm2, %v3319_v15  ;;  %2830 = vmatprep.mubr.msk.f32.mxu0 %vm348_vm2, %v3546_v60 }
  0x89   : > { %2715 = vmatmul.mubr.msk.f32.gmra.mrb[2].mxu1 %vm348_vm2, %v3324_v18 }
  0x8a   : > { %2831 = vmatmul.mubr.msk.f32.gmra.mrb[10].mxu0 %vm348_vm2, %v3564_v41  ;;  %2717 = vmatprep.mubr.msk.f32.mxu1 %vm348_vm2, %v3336_v25 }
  0x8b   : > { %2833 = vmatprep.mubr.msk.f32.mxu0 %vm348_vm2, %v1124_v34 }
  0x8d   : > { %2718 = vmatmul.mubr.msk.f32.gmra.mrb[4].mxu1 %vm348_vm2, %v3339_v26 }
  0x8e   : > { %2834 = vmatmul.mubr.msk.f32.gmra.mrb[12].mxu0 %vm348_vm2, %v1126_v1  ;;  %2720 = vmatprep.mubr.msk.f32.mxu1 %vm348_vm2, %v3350_v31 }
  0x8f   : > { %2836 = vmatprep.mubr.msk.f32.mxu0 %vm348_vm2, %v3522_v33 }
  0x91   : > { %2721 = vmatmul.mubr.msk.f32.gmra.mrb[6].mxu1 %vm348_vm2, %v3353_v32 }
  0x92   : > { %2837 = vmatmul.mubr.msk.f32.gmra.mrb[14].mxu0 %vm348_vm2, %v3538_v58  ;;  %2723 = vmatprep.mubr.msk.f32.mxu1 %vm348_vm2, %v3407_v47 }
  0x93   : > { %2841 = vmatprep.mubr.msk.f32.mxu0 %vm348_vm2, %v3469_v10 }
  0x95   : > { %2724 = vmatmul.mubr.msk.f32.gmra.mrb[8].mxu1 %vm348_vm2, %v3410_v48 }
  0x96   : > { %2842 = vmatmul.mubr.msk.f32.vlgmr.msra.gmra.mrb[0].mxu0 %vm348_vm2, %v3486_v17  ;;  %2726 = vmatprep.mubr.msk.f32.mxu1 %vm348_vm2, %v3430_v54 }
  0x97   : > { %2844 = vmatprep.mubr.msk.f32.mxu0 %vm348_vm2, %v3509_v30 }
  0x99   : > { %2727 = vmatmul.mubr.msk.f32.gmra.mrb[10].mxu1 %vm348_vm2, %v3433_v55 }
  0x9a   : > { %2845 = vmatmul.mubr.msk.f32.gmra.mrb[2].mxu0 %vm348_vm2, %v3543_v59  ;;  %2729 = vmatprep.mubr.msk.f32.mxu1 %vm348_vm2, %v3472_v12 }
  0x9b   : > { %2847 = vmatprep.mubr.msk.f32.mxu0 %vm348_vm2, %v3553_v62 }
  0x9d   : > { %2730 = vmatmul.mubr.msk.f32.gmra.mrb[12].mxu1 %vm348_vm2, %v3475_v13 }
  0x9e   : > { %2848 = vmatmul.mubr.msk.f32.gmra.mrb[4].mxu0 %vm348_vm2, %v3569_v7  ;;  %2732 = vmatprep.mubr.msk.f32.mxu1 %vm348_vm2, %v3597_v45 }
  0x9f   : > { %2850 = vmatprep.mubr.msk.f32.mxu0 %vm348_vm2, %v3573_v24 }
  0xa1   : > { %2733 = vmatmul.mubr.msk.f32.gmra.mrb[14].mxu1 %vm348_vm2, %v3600_v46 }
  0xa2   : > { %2851 = vmatmul.mubr.msk.f32.gmra.mrb[6].mxu0 %vm348_vm2, %v3586_v49  ;;  %2749 = vmatprep.mubr.msk.f32.mxu1 %vm348_vm2, %v3459_v2 }
  0xa3   : > { %2853 = vmatprep.mubr.msk.f32.mxu0 %vm348_vm2, %v3590_v39 }
  0xa5   : > { %2750 = vmatmul.mubr.msk.f32.vlgmr.msra.gmra.mrb[8].mxu1 %vm348_vm2, %v3483_v16 }
  0xa6   : > { %2854 = vmatmul.mubr.msk.f32.gmra.mrb[8].mxu0 %vm348_vm2, %v3614_v63  ;;  %2752 = vmatprep.mubr.msk.f32.mxu1 %vm348_vm2, %v3499_v23 }
  0xa7   : > { %2856 = vmatprep.mubr.msk.f32.mxu0 %vm348_vm2, %v3618_v61 }
  0xa9   : > { %2753 = vmatmul.mubr.msk.f32.gmra.mrb[10].mxu1 %vm348_vm2, %v3534_v53 }
  0xaa   : > { %2857 = vmatmul.mubr.msk.f32.gmra.mrb[10].mxu0 %vm348_vm2, %v3635_v40  ;;  %2755 = vmatprep.mubr.msk.f32.mxu1 %vm348_vm2, %v3546_v60 }
  0xab   : > { %2859 = vmatprep.mubr.msk.f32.mxu0 %vm348_vm2, %v3639_v28 }
  0xad   : > { %2756 = vmatmul.mubr.msk.f32.gmra.mrb[12].mxu1 %vm348_vm2, %v3564_v41 }
  0xae   : > { %2860 = vmatmul.mubr.msk.f32.gmra.mrb[12].mxu0 %vm348_vm2, %v3650_v29  ;;  %2758 = vmatprep.mubr.msk.f32.mxu1 %vm348_vm2, %v1124_v34 }
  0xaf   : > { %2862 = vmatprep.mubr.msk.f32.mxu0 %vm348_vm2, %v3527_v50 }
  0xb1   : > { %2759 = vmatmul.mubr.msk.f32.gmra.mrb[14].mxu1 %vm348_vm2, %v1126_v1 }
  0xb2   : > { %2863 = vmatmul.mubr.msk.f32.gmra.mrb[14].mxu0 %vm348_vm2, %v3550_v3 }
 0x158   : > { %v2713_v9 = vpop.f32.mrb[0].mxu1 }
 0x159   : > { %v1026_v15 = vpop.f32.mrb[1].mxu1 }
 0x15c   : > { %v2716_v18 = vpop.f32.mrb[2].mxu1 }
 0x15d   : > { %v1036_v25 = vpop.f32.mrb[3].mxu1 }
 0x160   : > { %v2719_v26 = vpop.f32.mrb[4].mxu1 }
 0x161   : > { %v1046_v31 = vpop.f32.mrb[5].mxu1 }
 0x164   : > { %v2722_v32 = vpop.f32.mrb[6].mxu1 }
 0x165   : > { %v1056_v36 = vpop.f32.mrb[7].mxu1 }
 0x169   : > { %v2843_v38 = vpop.f32.mrb[0].mxu0 }
 0x16a   : > { %v2867_v44 = vadd.f32 %v2843_v38, %v2713_v9  ;;  %v1900_v47 = vpop.f32.mrb[1].mxu0 }
 0x16b   : > { %v2868_v48 = vadd.f32 %v1900_v47, %v1026_v15 }
 0x16c   : > { %v3877_v51 = vadd.f32 %v2867_v44, %v3869_v42 }
 0x16d   : > { %v3880_v54 = vadd.f32 %v2868_v48, %v3869_v42  ;;  %v2846_v55 = vpop.f32.mrb[2].mxu0 }
 0x16e   : > { %2020 = vst.msk [vmem:[%s3874_s6 + $0x8] sm:$0xff] %vm2018_vm4, %v3877_v51  ;;  %v2036_v56 = vsel %vm2018_vm4, %v3877_v51, 0.0  ;;  %v2869_v0 = vadd.f32 %v2846_v55, %v2716_v18  ;;  %v1910_v2 = vpop.f32.mrb[3].mxu0 }
 0x16f   : > { %2019 = vst.msk [vmem:[%s3874_s6] sm:$0xff] %vm2018_vm4, %v3880_v54  ;;  %v2035_v10 = vsel %vm2018_vm4, %v3880_v54, 0.0  ;;  %v2870_v12 = vadd.f32 %v1910_v2, %v1036_v25 }
 0x170   : > { %v2037_v13 = vadd.f32 %v2036_v56, %v2035_v10  ;;  %v3893_v14 = vadd.f32 %v2869_v0, %v3869_v42 }
 0x171   : > { %v3896_v16 = vadd.f32 %v2870_v12, %v3869_v42  ;;  %v2849_v17 = vpop.f32.mrb[4].mxu0 }
 0x172   : > { %2022 = vst.msk [vmem:[%s3874_s6 + $0x18] sm:$0xff] %vm2018_vm4, %v3893_v14  ;;  %v2871_v21 = vadd.f32 %v2849_v17, %v2719_v26  ;;  %v1920_v23 = vpop.f32.mrb[5].mxu0  ;;  %v2040_v58 = vsel %vm2018_vm4, %v3893_v14, 0.0 }
 0x173   : > { %2021 = vst.msk [vmem:[%s3874_s6 + $0x10] sm:$0xff] %vm2018_vm4, %v3896_v16  ;;  %v2038_v30 = vsel %vm2018_vm4, %v3896_v16, 0.0  ;;  %v2872_v33 = vadd.f32 %v1920_v23, %v1046_v31 }
 0x174   : > { %v2039_v50 = vadd.f32 %v2038_v30, %v2037_v13  ;;  %v3907_v53 = vadd.f32 %v2871_v21, %v3869_v42 }
 0x175   : > { %v3912_v59 = vadd.f32 %v2872_v33, %v3869_v42  ;;  %v2852_v60 = vpop.f32.mrb[6].mxu0 }
 0x176   : > { %2024 = vst.msk [vmem:[%s3874_s6 + $0x28] sm:$0xff] %vm2018_vm4, %v3907_v53  ;;  %v2041_v3 = vadd.f32 %v2040_v58, %v2039_v50  ;;  %v2873_v62 = vadd.f32 %v2852_v60, %v2722_v32  ;;  %v1930_v41 = vpop.f32.mrb[7].mxu0  ;;  %v2044_v46 = vsel %vm2018_vm4, %v3907_v53, 0.0 }
 0x177   : > { %2023 = vst.msk [vmem:[%s3874_s6 + $0x20] sm:$0xff] %vm2018_vm4, %v3912_v59  ;;  %v2042_v7 = vsel %vm2018_vm4, %v3912_v59, 0.0  ;;  %v2874_v24 = vadd.f32 %v1930_v41, %v1056_v36 }
 0x178   : > { %v2043_v49 = vadd.f32 %v2042_v7, %v2041_v3  ;;  %v3923_v39 = vadd.f32 %v2873_v62, %v3869_v42  ;;  %v2751_v45 = vpop.f32.mrb[8].mxu1 }
 0x179   : > { %v3928_v52 = vadd.f32 %v2874_v24, %v3869_v42  ;;  %v2855_v63 = vpop.f32.mrb[8].mxu0  ;;  %v1242_v61 = vpop.f32.mrb[9].mxu1 }
 0x17a   : > { %2026 = vst.msk [vmem:[%s3874_s6 + $0x38] sm:$0xff] %vm2018_vm4, %v3923_v39  ;;  %v2045_v19 = vadd.f32 %v2044_v46, %v2043_v49  ;;  %v2875_v35 = vadd.f32 %v2855_v63, %v2751_v45  ;;  %v1940_v20 = vpop.f32.mrb[9].mxu0  ;;  %v2048_v27 = vsel %vm2018_vm4, %v3923_v39, 0.0 }
 0x17b   : > { %2025 = vst.msk [vmem:[%s3874_s6 + $0x30] sm:$0xff] %vm2018_vm4, %v3928_v52  ;;  %v2046_v40 = vsel %vm2018_vm4, %v3928_v52, 0.0  ;;  %v2876_v22 = vadd.f32 %v1940_v20, %v1242_v61 }
 0x17c   : > { %v2047_v28 = vadd.f32 %v2046_v40, %v2045_v19  ;;  %v3939_v29 = vadd.f32 %v2875_v35, %v3869_v42  ;;  %v2754_v37 = vpop.f32.mrb[10].mxu1 }
 0x17d   : > { %v3944_v8 = vadd.f32 %v2876_v22, %v3869_v42  ;;  %v2858_v43 = vpop.f32.mrb[10].mxu0  ;;  %v1252_v57 = vpop.f32.mrb[11].mxu1 }
 0x17e   : > { %2028 = vst.msk [vmem:[%s3874_s6 + $0x48] sm:$0xff] %vm2018_vm4, %v3939_v29  ;;  %v2049_v4 = vadd.f32 %v2048_v27, %v2047_v28  ;;  %v2877_v5 = vadd.f32 %v2858_v43, %v2754_v37  ;;  %v1950_v11 = vpop.f32.mrb[11].mxu0  ;;  %v2052_v18 = vsel %vm2018_vm4, %v3939_v29, 0.0 }
 0x17f   : > { %2027 = vst.msk [vmem:[%s3874_s6 + $0x40] sm:$0xff] %vm2018_vm4, %v3944_v8  ;;  %v2050_v6 = vsel %vm2018_vm4, %v3944_v8, 0.0  ;;  %v2878_v34 = vadd.f32 %v1950_v11, %v1252_v57 }
 0x180   : > { %v2051_v1 = vadd.f32 %v2050_v6, %v2049_v4  ;;  %v2013_v9 = vadd.f32 %v2877_v5, %v3869_v42  ;;  %v2757_v15 = vpop.f32.mrb[12].mxu1 }
 0x181   : > { %v2012_v25 = vadd.f32 %v2878_v34, %v3869_v42  ;;  %v2861_v26 = vpop.f32.mrb[12].mxu0  ;;  %v1262_v31 = vpop.f32.mrb[13].mxu1 }
 0x182   : > { %2030 = vst.msk [vmem:[%s3874_s6 + $0x58] sm:$0xff] %vm2018_vm4, %v2013_v9  ;;  %v2053_v32 = vadd.f32 %v2052_v18, %v2051_v1  ;;  %v2879_v36 = vadd.f32 %v2861_v26, %v2757_v15  ;;  %v1960_v38 = vpop.f32.mrb[13].mxu0  ;;  %v2056_v0 = vsel %vm2018_vm4, %v2013_v9, 0.0 }
 0x183   : > { %2029 = vst.msk [vmem:[%s3874_s6 + $0x50] sm:$0xff] %vm2018_vm4, %v2012_v25  ;;  %v2054_v44 = vsel %vm2018_vm4, %v2012_v25, 0.0  ;;  %v2880_v47 = vadd.f32 %v1960_v38, %v1262_v31 }
 0x184   : > { %v2055_v48 = vadd.f32 %v2054_v44, %v2053_v32  ;;  %v2015_v55 = vadd.f32 %v2879_v36, %v3869_v42  ;;  %v2760_v56 = vpop.f32.mrb[14].mxu1 }
 0x185   : > { %v2014_v2 = vadd.f32 %v2880_v47, %v3869_v42  ;;  %v2864_v10 = vpop.f32.mrb[14].mxu0  ;;  %v1272_v12 = vpop.f32.mrb[15].mxu1 }
 0x186   : > { %2032 = vst.msk [vmem:[%s3874_s6 + $0x68] sm:$0xff] %vm2018_vm4, %v2015_v55  ;;  %v2057_v13 = vadd.f32 %v2056_v0, %v2055_v48  ;;  %v2881_v17 = vadd.f32 %v2864_v10, %v2760_v56  ;;  %v1970_v21 = vpop.f32.mrb[15].mxu0  ;;  %v2060_v58 = vsel %vm2018_vm4, %v2015_v55, 0.0 }
 0x187   : > { %2031 = vst.msk [vmem:[%s3874_s6 + $0x60] sm:$0xff] %vm2018_vm4, %v2014_v2  ;;  %v2058_v23 = vsel %vm2018_vm4, %v2014_v2, 0.0  ;;  %v2882_v30 = vadd.f32 %v1970_v21, %v1272_v12 }
 0x188   : > { %v2059_v33 = vadd.f32 %v2058_v23, %v2057_v13  ;;  %v2017_v50 = vadd.f32 %v2881_v17, %v3869_v42 }
 0x189   : > { %v2016_v60 = vadd.f32 %v2882_v30, %v3869_v42 }
 0x18a   : > { %2034 = vst.msk [vmem:[%s3874_s6 + $0x78] sm:$0xff] %vm2018_vm4, %v2017_v50  ;;  %v2061_v3 = vadd.f32 %v2060_v58, %v2059_v33  ;;  %v2064_v7 = vsel %vm2018_vm4, %v2017_v50, 0.0 }
 0x18b   : > { %2033 = vst.msk [vmem:[%s3874_s6 + $0x70] sm:$0xff] %vm2018_vm4, %v2016_v60  ;;  %v2062_v62 = vsel %vm2018_vm4, %v2016_v60, 0.0  ;;  %s3074_s6 = scalar_lea.vmem %s3073_s5, 64 }
 0x18c   : > { %v2063_v41 = vadd.f32 %v2062_v62, %v2061_v3  ;;  %p3076_p6 = scmp.lt.s32.totalorder %s3074_s6, %s3068_s19 }
 0x18e   : > { %v2065_v24 = vadd.f32 %v2064_v7, %v2063_v41  ;;  %p3077_p7 = por %p3076_p6, %p3075_p5 }
 0x190   : > { %v2066_v49 = vrot.slane %v2065_v24, 4  ;;  %p3078_p9 = pnand %p3077_p7, %p3071_p4 }
 0x192   : > { %v2067_v45 = vadd.f32 %v2066_v49, %v2065_v24 }
 0x194   : > { %v2068_v46 = vrot.slane %v2067_v45, 2 }
 0x196   : > { %v2069_v63 = vadd.f32 %v2068_v46, %v2067_v45 }
 0x198   : > { %v2070_v61 = vrot.slane %v2069_v63, 1 }
 0x19a   : > { %v3980_v19 = vadd.f32 %v2070_v61, %v2069_v63 }
 0x19c   : > { %v2073_v42 = vmul.f32 0.0078125, %v3980_v19 }
 0x19e   : > { %v2074_v35 = vsub.f32 %v3880_v54, %v2073_v42  ;;  %v2075_v20 = vsub.f32 %v3877_v51, %v2073_v42  ;;  %v2076_v40 = vsub.f32 %v3896_v16, %v2073_v42  ;;  %v2077_v22 = vsub.f32 %v3893_v14, %v2073_v42 }
 0x19f   : > { %v2078_v28 = vsub.f32 %v3912_v59, %v2073_v42  ;;  %v2079_v37 = vsub.f32 %v3907_v53, %v2073_v42  ;;  %v2080_v27 = vsub.f32 %v3928_v52, %v2073_v42  ;;  %v2081_v43 = vsub.f32 %v3923_v39, %v2073_v42 }
 0x1a0   : > { %v2082_v57 = vsub.f32 %v3944_v8, %v2073_v42  ;;  %v2083_v4 = vsub.f32 %v3939_v29, %v2073_v42  ;;  %v2084_v5 = vsub.f32 %v2012_v25, %v2073_v42  ;;  %v2085_v54 = vsub.f32 %v2013_v9, %v2073_v42 }
 0x1a1   : > { %v2086_v11 = vsub.f32 %v2014_v2, %v2073_v42  ;;  %v2087_v51 = vsub.f32 %v2015_v55, %v2073_v42  ;;  %v2088_v6 = vsub.f32 %v2016_v60, %v2073_v42  ;;  %v2089_v16 = vsub.f32 %v2017_v50, %v2073_v42 }
 0x1a2   : > { %v2090_v34 = vmul.f32 %v2074_v35, %v2074_v35  ;;  %v2091_v14 = vmul.f32 %v2075_v20, %v2075_v20  ;;  %v2092_v1 = vmul.f32 %v2076_v40, %v2076_v40  ;;  %v2093_v59 = vmul.f32 %v2077_v22, %v2077_v22 }
 0x1a3   : > { %v2095_v15 = vmul.f32 %v2079_v37, %v2079_v37  ;;  %v2096_v53 = vmul.f32 %v2080_v27, %v2080_v27  ;;  %v2097_v18 = vmul.f32 %v2081_v43, %v2081_v43  ;;  %v2098_v52 = vmul.f32 %v2082_v57, %v2082_v57 }
 0x1a4   : > { %v2099_v26 = vmul.f32 %v2083_v4, %v2083_v4  ;;  %v2100_v39 = vmul.f32 %v2084_v5, %v2084_v5  ;;  %v2094_v31 = vmul.f32 %v2078_v28, %v2078_v28  ;;  %v2101_v8 = vmul.f32 %v2085_v54, %v2085_v54 }
 0x1a5   : > { %v2102_v32 = vmul.f32 %v2086_v11, %v2086_v11  ;;  %v2103_v29 = vmul.f32 %v2087_v51, %v2087_v51  ;;  %v2104_v25 = vmul.f32 %v2088_v6, %v2088_v6  ;;  %v2105_v9 = vmul.f32 %v2089_v16, %v2089_v16 }
 0x1a6   : > { %v2106_v36 = vsel %vm2018_vm4, %v2090_v34, 0.0  ;;  %v2107_v38 = vsel %vm2018_vm4, %v2091_v14, 0.0  ;;  %v2109_v47 = vsel %vm2018_vm4, %v2092_v1, 0.0  ;;  %v2115_v48 = vsel %vm2018_vm4, %v2095_v15, 0.0 }
 0x1a7   : > { %v2108_v44 = vadd.f32 %v2107_v38, %v2106_v36  ;;  %v2117_v55 = vsel %vm2018_vm4, %v2096_v53, 0.0  ;;  %v2119_v56 = vsel %vm2018_vm4, %v2097_v18, 0.0  ;;  %v2121_v0 = vsel %vm2018_vm4, %v2098_v52, 0.0 }
 0x1a8   : > { %v2123_v2 = vsel %vm2018_vm4, %v2099_v26, 0.0  ;;  %v2125_v10 = vsel %vm2018_vm4, %v2100_v39, 0.0  ;;  %v2127_v13 = vsel %vm2018_vm4, %v2101_v8, 0.0  ;;  %v2129_v17 = vsel %vm2018_vm4, %v2102_v32, 0.0 }
 0x1a9   : > { %v2110_v12 = vadd.f32 %v2109_v47, %v2108_v44  ;;  %v2131_v21 = vsel %vm2018_vm4, %v2103_v29, 0.0  ;;  %v2111_v23 = vsel %vm2018_vm4, %v2093_v59, 0.0  ;;  %v2133_v30 = vsel %vm2018_vm4, %v2104_v25, 0.0 }
 0x1aa   : > { %v2135_v33 = vsel %vm2018_vm4, %v2105_v9, 0.0  ;;  %v2113_v58 = vsel %vm2018_vm4, %v2094_v31, 0.0 }
 0x1ab   : > { %v2112_v50 = vadd.f32 %v2111_v23, %v2110_v12 }
 0x1ad   : > { %v2114_v60 = vadd.f32 %v2113_v58, %v2112_v50 }
 0x1af   : > { %v2116_v3 = vadd.f32 %v2115_v48, %v2114_v60 }
 0x1b1   : > { %v2118_v62 = vadd.f32 %v2117_v55, %v2116_v3 }
 0x1b3   : > { %v2120_v41 = vadd.f32 %v2119_v56, %v2118_v62 }
 0x1b5   : > { %v2122_v7 = vadd.f32 %v2121_v0, %v2120_v41 }
 0x1b7   : > { %v2124_v24 = vadd.f32 %v2123_v2, %v2122_v7 }
 0x1b9   : > { %v2126_v49 = vadd.f32 %v2125_v10, %v2124_v24 }
 0x1bb   : > { %v2128_v45 = vadd.f32 %v2127_v13, %v2126_v49 }
 0x1bd   : > { %v2130_v46 = vadd.f32 %v2129_v17, %v2128_v45 }
 0x1bf   : > { %v2132_v63 = vadd.f32 %v2131_v21, %v2130_v46 }
 0x1c1   : > { %v2134_v61 = vadd.f32 %v2133_v30, %v2132_v63 }
 0x1c3   : > { %v2136_v42 = vadd.f32 %v2135_v33, %v2134_v61 }
 0x1c5   : > { %v2137_v35 = vrot.slane %v2136_v42, 4 }
 0x1c7   : > { %v2138_v20 = vadd.f32 %v2137_v35, %v2136_v42 }
 0x1c9   : > { %v2139_v40 = vrot.slane %v2138_v20, 2 }
 0x1cb   : > { %v2140_v22 = vadd.f32 %v2139_v40, %v2138_v20 }
 0x1cd   : > { %v2141_v28 = vrot.slane %v2140_v22, 1 }
 0x1cf   : > { %v2142_v37 = vadd.f32 %v2141_v28, %v2140_v22 }
 0x1d1   : > { %v2144_v27 = vsel %vm2143_vm5, %v3980_v19, %v2142_v37 }
 0x1d2   : > { %2146 = vst.msk [vmem:[%s229_s12] sm:$0x3] %vm2145_vm6, %v2144_v27 }
 0x1d3   : > { %3081 = shalt.err (!%p3078_p9)
}
 0x1d4   : > { %s3082_s14 = scalar_lea.hbm %s4015_s27, 32  ;;  %s3086_s10 = scalar_lea.hbm %s4073_s4, 128 }
 0x1d5   : > { %p3083_p10 = scmp.ne.s32.totalorder %s4015_s27, %s3082_s14  ;;  %p3087_p13 = scmp.lt.u32.totalorder %s4015_s27, %s4073_s4 }
 0x1d6   : > { %p3088_p0 = scmp.lt.u32.totalorder %s3086_s10, %s3082_s14  ;;  %p3090_p2 = scmp.lt.u32.totalorder %s3082_s14, %s4015_s27 }
 0x1d7   : > { %p3084_p11 = pnand %p3083_p10, %p3241_p3 }
 0x1d8   : > { %p3089_p1 = por %p3088_p0, %p3087_p13 }
 0x1d9   : > { %p3085_p12 = pneg %p3084_p11 }
 0x1da   : > { %p3091_p4 = por %p3090_p2, %p3089_p1 }
 0x1dc   : > { %p3092_p5 = pnand %p3091_p4, %p3085_p12 }
 0x1de   : > { %3095 = shalt.err (!%p3092_p5)
}
 0x1df   : > { %2997 = dma.vmem_to_hbm [thread:$0]  (%p3241_p3), %s4017_s13, 32, %s4015_s27, %s2158_s18  }
 0x1e0 PF: > { %p3003_p6 = scmp.ge.s32.totalorder %s3162_s22, 2  ;;  %s2202_s23 = sand.u32 1, %s3134_s15  }
 0x1e1   : > { %s2203_s24 = scalar_lea.sflag [#allocation3], %s2202_s23 }
 0x1e2   : > { %p3000_p7 = pnand %p3003_p6, %p3250_p8 }
 0x1e4   : > { %3129 = dma.done.wait (!%p3000_p7), %s2203_s24, 32  }
 0x1e5   : > { %3131 = vsyncadd (!%p3000_p7), %s2203_s24, 4294967264  ;;  %s18_s22 = sadd.s32 1, %s3162_s22   ;;  %s4076_s15 = smov %s3138_s16 }
 0x1e6   : > { %p15_p9 = scmp.ge.s32.totalorder %s18_s22, 6   ;;  %s4077_s16 = smov %s3142_s17 }
 0x1e7   : > { %s4078_s17 = smov %s3259_s7  ;;  %s4079_s18 = smov %s3154_s20 }
 0x1e8   : > { %s4080_s19 = smov %s3158_s21  ;;  %s4081_s20 = smov %s4084_s25 }
 0x1e9   : > { %s4082_s21 = smov %s4088_s26  ;;  %17 = sbr.rel (!%p15_p9) target bundleno = 5 (0x5), region = 87 }
 0x1f0   :  { %2208 = vsyncpa [#allocation3], 1 }
 0x1f1   :  { %2210 = vsyncpa [#allocation3 + $0x1], 1 }

</bundles_post_ra>
